<compile_context>
chip_gen: v7x
topology: tpu7x:2x2x1
jax: 0.10.0
libtpu: 0.0.40
codegen_flags: <defaults>
</compile_context>

<pallas_src>
import math

import jax
import jax.numpy as jnp
from jax import lax
from jax.experimental import pallas as pl
from jax.experimental.pallas import tpu as pltpu


def _round_up(x, m):
    return ((x + m - 1) // m) * m


def _noisy_linear_kernel(x_ref, wmu_ref, wsig_ref, eps_in_ref, eps_out_ref,
                         b_ref, o_ref, acc_ref):
    """One (tm, tn) output tile, accumulating over the K grid axis (axis 2)."""
    k = pl.program_id(2)

    @pl.when(k == 0)
    def _():
        acc_ref[...] = jnp.zeros_like(acc_ref)

    x = x_ref[...]                              # (tm, tk)
    xs = x * eps_in_ref[...]                    # (tm, tk), row-broadcast of eps_in

    # Contract last dim of x/xs against last dim of the (tn, tk) weight tiles —
    # no explicit transpose, MXU accumulates in f32.
    dn = (((1,), (1,)), ((), ()))
    mu_part = lax.dot_general(x, wmu_ref[...], dimension_numbers=dn,
                              preferred_element_type=jnp.float32)       # (tm, tn)
    sig_part = lax.dot_general(xs, wsig_ref[...], dimension_numbers=dn,
                               preferred_element_type=jnp.float32)      # (tm, tn)
    acc_ref[...] += mu_part + sig_part * eps_out_ref[...]

    @pl.when(k == pl.num_programs(2) - 1)
    def _():
        o_ref[...] = (acc_ref[...] + b_ref[...]).astype(o_ref.dtype)


def noisy_linear(x, weight_mu, weight_sigma, eps_in, eps_out,
                 bias_mu, bias_sigma, bias_epsilon):
    """Pallas implementation of NoisyLinear.forward (factorized noise).

    x:            (B, in_features)       float32
    weight_mu:    (out_features, in_features)
    weight_sigma: (out_features, in_features)
    eps_in:       (in_features,)    factorized noise (weight_epsilon = outer(eps_out, eps_in))
    eps_out:      (out_features,)
    bias_*:       (out_features,)
    returns:      (B, out_features) float32
    """
    B, in_f = x.shape
    out_f, in_f2 = weight_mu.shape
    assert in_f == in_f2

    # Effective bias computed once on the host side of the call (tiny).
    b_eff = (bias_mu + bias_sigma * bias_epsilon).reshape(1, out_f)

    # Tile sizes: lane-dense (multiples of 128 on the last dim), second-to-last
    # multiple of 8, sized well under the v7x 32 MiB default scoped VMEM even
    # with double buffering.
    tm = min(128, _round_up(B, 8))
    tk = min(512, _round_up(in_f, 128))
    tn = min(256, _round_up(out_f, 128))

    B_p = _round_up(B, tm)
    K_p = _round_up(in_f, tk)
    N_p = _round_up(out_f, tn)

    # Zero-padding keeps the math exact (padded columns contribute 0, padded
    # output rows/cols are sliced off below).
    x_p = jnp.pad(x, ((0, B_p - B), (0, K_p - in_f)))
    wmu_p = jnp.pad(weight_mu, ((0, N_p - out_f), (0, K_p - in_f)))
    wsig_p = jnp.pad(weight_sigma, ((0, N_p - out_f), (0, K_p - in_f)))
    eps_in_p = jnp.pad(eps_in.reshape(1, in_f), ((0, 0), (0, K_p - in_f)))
    eps_out_p = jnp.pad(eps_out.reshape(1, out_f), ((0, 0), (0, N_p - out_f)))
    b_p = jnp.pad(b_eff, ((0, 0), (0, N_p - out_f)))

    grid = (B_p // tm, N_p // tn, K_p // tk)

    out_p = pl.pallas_call(
        _noisy_linear_kernel,
        out_shape=jax.ShapeDtypeStruct((B_p, N_p), x.dtype),
        grid_spec=pltpu.PrefetchScalarGridSpec(
            num_scalar_prefetch=0,
            grid=grid,
            in_specs=[
                pl.BlockSpec((tm, tk), lambda i, j, k: (i, k)),   # x
                pl.BlockSpec((tn, tk), lambda i, j, k: (j, k)),   # weight_mu
                pl.BlockSpec((tn, tk), lambda i, j, k: (j, k)),   # weight_sigma
                pl.BlockSpec((1, tk), lambda i, j, k: (0, k)),    # eps_in
                pl.BlockSpec((1, tn), lambda i, j, k: (0, j)),    # eps_out
                pl.BlockSpec((1, tn), lambda i, j, k: (0, j)),    # effective bias
            ],
            out_specs=pl.BlockSpec((tm, tn), lambda i, j, k: (i, j)),
            scratch_shapes=[pltpu.VMEM((tm, tn), jnp.float32)],
        ),
        compiler_params=pltpu.CompilerParams(
            dimension_semantics=("parallel", "parallel", "arbitrary")),
    )(x_p, wmu_p, wsig_p, eps_in_p, eps_out_p, b_p)

    return out_p[:B, :out_f]


# ------------------------- deterministic parameter setup -------------------------

def scale_noise(key, size):
    # Matches NoisyLinear.scale_noise: x.sign() * sqrt(|x|), x ~ N(0, 1)
    x = jax.random.normal(key, (size,), dtype=jnp.float32)
    return jnp.sign(x) * jnp.sqrt(jnp.abs(x))


def make_noisy_linear_params(key, in_features, out_features, std_init=0.5):
    k_wmu, k_bmu, k_eps_in, k_eps_out = jax.random.split(key, 4)
    mu_range = 1.0 / math.sqrt(in_features)

    weight_mu = jax.random.uniform(
        k_wmu, (out_features, in_features),
        minval=-mu_range, maxval=mu_range, dtype=jnp.float32)
    weight_sigma = jnp.full((out_features, in_features),
                            std_init / math.sqrt(in_features), dtype=jnp.float32)
    bias_mu = jax.random.uniform(
        k_bmu, (out_features,),
        minval=-mu_range, maxval=mu_range, dtype=jnp.float32)
    bias_sigma = jnp.full((out_features,),
                          std_init / math.sqrt(out_features), dtype=jnp.float32)

    # Factorized Gaussian noise (reset_noise) — kept factorized, never outer()'d
    # for the kernel; weight_epsilon is only materialized in the reference check.
    eps_in = scale_noise(k_eps_in, in_features)     # (in,)
    eps_out = scale_noise(k_eps_out, out_features)  # (out,)
    bias_epsilon = eps_out                          # (out,)

    return (weight_mu, weight_sigma, eps_in, eps_out,
            bias_mu, bias_sigma, bias_epsilon)


if __name__ == "__main__":
    key = jax.random.PRNGKey(0)
    k_params, k_x = jax.random.split(key)

    batch, in_features, out_features = 8, 32, 64
    params = make_noisy_linear_params(k_params, in_features, out_features)
    x = jax.random.normal(k_x, (batch, in_features), dtype=jnp.float32)

    out = noisy_linear(x, *params)
    out = jax.block_until_ready(out)

    # Pure-JAX reference check against the ORIGINAL (materialized-epsilon) math.
    wmu, wsig, eps_in, eps_out, bmu, bsig, beps = params
    weight_epsilon = jnp.outer(eps_out, eps_in)     # == eps_out.ger(eps_in)
    w_eff = wmu + wsig * weight_epsilon
    b_eff = bmu + bsig * beps
    ref = x @ w_eff.T + b_eff

    assert out.shape == (batch, out_features)
    assert jnp.allclose(out, ref, atol=1e-4, rtol=1e-4), "mismatch vs reference"
    print("KERNEL_OK")
</pallas_src>

<mosaic_0001>
module attributes {stable_mosaic.version = 11 : i64} {
  func.func @_noisy_linear_kernel(%arg0: i32, %arg1: i32, %arg2: i32, %arg3: memref<8x128xf32, #tpu.memory_space<vmem>>, %arg4: memref<128x128xf32, #tpu.memory_space<vmem>>, %arg5: memref<128x128xf32, #tpu.memory_space<vmem>>, %arg6: memref<1x128xf32, #tpu.memory_space<vmem>>, %arg7: memref<1x128xf32, #tpu.memory_space<vmem>>, %arg8: memref<1x128xf32, #tpu.memory_space<vmem>>, %arg9: memref<8x128xf32, #tpu.memory_space<vmem>>, %arg10: memref<8x128xf32, #tpu.memory_space<vmem>>) attributes {dimension_semantics = [#tpu.dimension_semantics<parallel>, #tpu.dimension_semantics<parallel>, #tpu.dimension_semantics<arbitrary>], iteration_bounds = array<i64: 1, 1, 1>, scalar_prefetch = 0 : i64, scratch_operands = 1 : i64, tpu.core_type = #tpu.core_type<tc>, window_params = [{transform_indices = @transform_0, window_bounds = array<i64: 8, 128>}, {transform_indices = @transform_1, window_bounds = array<i64: 128, 128>}, {transform_indices = @transform_2, window_bounds = array<i64: 128, 128>}, {transform_indices = @transform_3, window_bounds = array<i64: 1, 128>}, {transform_indices = @transform_4, window_bounds = array<i64: 1, 128>}, {transform_indices = @transform_5, window_bounds = array<i64: 1, 128>}, {transform_indices = @transform_6, window_bounds = array<i64: 8, 128>}]} {
    %c0_i32 = arith.constant 0 : i32
    %0 = arith.cmpi eq, %arg2, %c0_i32 : i32
    %1 = arith.extui %0 : i1 to i32
    %c0_i32_0 = arith.constant 0 : i32
    %2 = arith.cmpi ne, %1, %c0_i32_0 : i32
    scf.if %2 {
      %cst_17 = arith.constant 0.000000e+00 : f32
      %21 = vector.broadcast %cst_17 : f32 to vector<8x128xf32>
      %c0_18 = arith.constant 0 : index
      %c0_19 = arith.constant 0 : index
      %22 = vector.load %arg10[%c0_18, %c0_19] : memref<8x128xf32, #tpu.memory_space<vmem>>, vector<8x128xf32>
      tpu.vector_store %arg10[%c0_18, %c0_19], %21 {strides = array<i32>} : memref<8x128xf32, #tpu.memory_space<vmem>>, vector<8x128xf32>,
    } else {
    }
    %c0 = arith.constant 0 : index
    %c0_1 = arith.constant 0 : index
    %3 = vector.load %arg3[%c0, %c0_1] : memref<8x128xf32, #tpu.memory_space<vmem>>, vector<8x128xf32>
    %c0_2 = arith.constant 0 : index
    %c0_3 = arith.constant 0 : index
    %4 = vector.load %arg6[%c0_2, %c0_3] : memref<1x128xf32, #tpu.memory_space<vmem>>, vector<1x128xf32>
    %5 = vector.broadcast %4 : vector<1x128xf32> to vector<8x128xf32>
    %6 = arith.mulf %3, %5 : vector<8x128xf32>
    %c0_4 = arith.constant 0 : index
    %c0_5 = arith.constant 0 : index
    %7 = vector.load %arg4[%c0_4, %c0_5] : memref<128x128xf32, #tpu.memory_space<vmem>>, vector<128x128xf32>
    %cst = arith.constant dense<0.000000e+00> : vector<8x128xf32>
    %8 = tpu.matmul %3, %7, %cst {dimension_numbers = #tpu.dot_dimension_numbers<[1], [1], [0], [0], [0, 0, 1, 0], [], []>} : vector<8x128xf32>, vector<128x128xf32>, vector<8x128xf32> -> vector<8x128xf32>
    %c0_6 = arith.constant 0 : index
    %c0_7 = arith.constant 0 : index
    %9 = vector.load %arg5[%c0_6, %c0_7] : memref<128x128xf32, #tpu.memory_space<vmem>>, vector<128x128xf32>
    %cst_8 = arith.constant dense<0.000000e+00> : vector<8x128xf32>
    %10 = tpu.matmul %6, %9, %cst_8 {dimension_numbers = #tpu.dot_dimension_numbers<[1], [1], [0], [0], [0, 0, 1, 0], [], []>} : vector<8x128xf32>, vector<128x128xf32>, vector<8x128xf32> -> vector<8x128xf32>
    %c0_9 = arith.constant 0 : index
    %c0_10 = arith.constant 0 : index
    %11 = vector.load %arg10[%c0_9, %c0_10] : memref<8x128xf32, #tpu.memory_space<vmem>>, vector<8x128xf32>
    %c0_11 = arith.constant 0 : index
    %c0_12 = arith.constant 0 : index
    %12 = vector.load %arg7[%c0_11, %c0_12] : memref<1x128xf32, #tpu.memory_space<vmem>>, vector<1x128xf32>
    %13 = vector.broadcast %12 : vector<1x128xf32> to vector<8x128xf32>
    %14 = arith.mulf %10, %13 : vector<8x128xf32>
    %15 = arith.addf %8, %14 : vector<8x128xf32>
    %16 = arith.addf %11, %15 : vector<8x128xf32>
    %c0_13 = arith.constant 0 : index
    %c0_14 = arith.constant 0 : index
    %17 = vector.load %arg10[%c0_13, %c0_14] : memref<8x128xf32, #tpu.memory_space<vmem>>, vector<8x128xf32>
    tpu.vector_store %arg10[%c0_13, %c0_14], %16 {strides = array<i32>} : memref<8x128xf32, #tpu.memory_space<vmem>>, vector<8x128xf32>,
    %c0_i32_15 = arith.constant 0 : i32
    %18 = arith.cmpi eq, %arg2, %c0_i32_15 : i32
    %19 = arith.extui %18 : i1 to i32
    %c0_i32_16 = arith.constant 0 : i32
    %20 = arith.cmpi ne, %19, %c0_i32_16 : i32
    scf.if %20 {
      %c0_17 = arith.constant 0 : index
      %c0_18 = arith.constant 0 : index
      %21 = vector.load %arg10[%c0_17, %c0_18] : memref<8x128xf32, #tpu.memory_space<vmem>>, vector<8x128xf32>
      %c0_19 = arith.constant 0 : index
      %c0_20 = arith.constant 0 : index
      %22 = vector.load %arg8[%c0_19, %c0_20] : memref<1x128xf32, #tpu.memory_space<vmem>>, vector<1x128xf32>
      %23 = vector.broadcast %22 : vector<1x128xf32> to vector<8x128xf32>
      %24 = arith.addf %21, %23 : vector<8x128xf32>
      %c0_21 = arith.constant 0 : index
      %c0_22 = arith.constant 0 : index
      %25 = vector.load %arg9[%c0_21, %c0_22] : memref<8x128xf32, #tpu.memory_space<vmem>>, vector<8x128xf32>
      tpu.vector_store %arg9[%c0_21, %c0_22], %24 {strides = array<i32>} : memref<8x128xf32, #tpu.memory_space<vmem>>, vector<8x128xf32>,
    } else {
    }
    return
  }
  func.func @transform_0(%arg0: i32, %arg1: i32, %arg2: i32) -> (i32, i32) {
    %c0_i32 = arith.constant 0 : i32
    return %arg0, %arg2 : i32, i32
  }
  func.func @transform_1(%arg0: i32, %arg1: i32, %arg2: i32) -> (i32, i32) {
    %c0_i32 = arith.constant 0 : i32
    return %arg1, %arg2 : i32, i32
  }
  func.func @transform_2(%arg0: i32, %arg1: i32, %arg2: i32) -> (i32, i32) {
    %c0_i32 = arith.constant 0 : i32
    return %arg1, %arg2 : i32, i32
  }
  func.func @transform_3(%arg0: i32, %arg1: i32, %arg2: i32) -> (i32, i32) {
    %c0_i32 = arith.constant 0 : i32
    %c0_i32_0 = arith.constant 0 : i32
    return %c0_i32, %arg2 : i32, i32
  }
  func.func @transform_4(%arg0: i32, %arg1: i32, %arg2: i32) -> (i32, i32) {
    %c0_i32 = arith.constant 0 : i32
    %c0_i32_0 = arith.constant 0 : i32
    return %c0_i32, %arg1 : i32, i32
  }
  func.func @transform_5(%arg0: i32, %arg1: i32, %arg2: i32) -> (i32, i32) {
    %c0_i32 = arith.constant 0 : i32
    %c0_i32_0 = arith.constant 0 : i32
    return %c0_i32, %arg1 : i32, i32
  }
  func.func @transform_6(%arg0: i32, %arg1: i32, %arg2: i32) -> (i32, i32) {
    %c0_i32 = arith.constant 0 : i32
    return %arg0, %arg1 : i32, i32
  }
}

</mosaic_0001>

<bundles_post_ra>
// kernel: tpu_custom_call.1
= control target key start
LH: loop header
LB: loop body
LE: loop exit
PB: predicated region body
PF: predicated region fallthrough
CT: control target
= control target key end

     0   :  { %11 = vsyncpa [#allocation4], 0  ;;  %s670_s0 = inlined_call_operand.hbm [shape: f32[8,128], index: 0, kind: input, shape index: {}]   ;;  %s671_s1 = inlined_call_operand.hbm [shape: f32[128,128], index: 1, kind: input, shape index: {}]   ;;  %s672_s2 = inlined_call_operand.hbm [shape: f32[128,128], index: 2, kind: input, shape index: {}]   ;;  %s673_s3 = inlined_call_operand.vmem [shape: f32[1,128], index: 3, kind: input, shape index: {}]   ;;  %s674_s4 = inlined_call_operand.vmem [shape: f32[1,128], index: 4, kind: input, shape index: {}]   ;;  %s675_s5 = inlined_call_operand.vmem [shape: f32[1,128], index: 5, kind: input, shape index: {}]   ;;  %s676_s6 = inlined_call_operand.hbm [shape: f32[8,128], index: 6, kind: output, shape index: {}]  }
   0x1   :  { %12 = vsyncpa [#allocation7], 0 }
   0x2   :  { %13 = vsyncpa [#allocation5], 0  ;;  %s547_s21 = smov [#allocation6]   ;;  %s453_s25 = scalar_lea.hbm %s671_s1, 2048 }
   0x3   :  { %s29_s22 = sshll.u32 %s547_s21, 4  ;;  %p454_p0 = scmp.ne.s32.totalorder %s671_s1, %s453_s25  ;;  %s30_s22 = int_to_ptr.vmem [resolvable:$true] %s29_s22 }
   0x4   :  { %p457_p1 = scmp.lt.u32.totalorder %s453_s25, %s671_s1 }
   0x6   :  { %p459_p2 = pnand %p457_p1, %p454_p0 }
   0x8   :  { %462 = shalt.err (!%p459_p2)
}
   0x9   :  { %s463_s30 = scalar_lea.vmem %s30_s22, 2048  ;;  %p468_p4 = scmp.lt.s32.totalorder %s30_s22, %s30_s22 }
   0xa   :  { %p464_p3 = scmp.ne.s32.totalorder %s30_s22, %s463_s30  ;;  %p469_p5 = scmp.lt.s32.totalorder %s463_s30, %s463_s30 }
   0xc   :  { %p470_p6 = por %p469_p5, %p468_p4 }
   0xe   :  { %p471_p7 = pnand %p470_p6, %p464_p3 }
  0x10   :  { %474 = shalt.err (!%p471_p7)
}
  0x11   :  { %s548_s7 = smov 128   ;;  %s549_s8 = smov 8  }
  0x12   :  { %35 = dma.hbm_to_vmem [thread:$0]  %s671_s1, 2048, %s30_s22, [#allocation7], %s548_s7, %s548_s7, %s549_s8  }
  0x13   :  { %s550_s11 = smov [#allocation3]   ;;  %s551_s13 = smov [#allocation8]  }
  0x14   :  { %s20_s12 = sshll.u32 %s550_s11, 4  ;;  %s41_s14 = sshll.u32 %s551_s13, 4  ;;  %s21_s12 = int_to_ptr.vmem [resolvable:$true] %s20_s12  ;;  %s42_s14 = int_to_ptr.vmem [resolvable:$true] %s41_s14 }
  0x15   :  { %s475_s17 = scalar_lea.hbm %s670_s0, 128 }
  0x16   :  { %p476_p8 = scmp.ne.s32.totalorder %s670_s0, %s475_s17  ;;  %p479_p9 = scmp.lt.u32.totalorder %s475_s17, %s670_s0 }
  0x18   :  { %p481_p10 = pnand %p479_p9, %p476_p8 }
  0x1a   :  { %484 = shalt.err (!%p481_p10)
}
  0x1b   :  { %s485_s1 = scalar_lea.vmem %s21_s12, 128  ;;  %p490_p12 = scmp.lt.s32.totalorder %s21_s12, %s21_s12 }
  0x1c   :  { %p486_p11 = scmp.ne.s32.totalorder %s21_s12, %s485_s1  ;;  %p491_p13 = scmp.lt.s32.totalorder %s485_s1, %s485_s1 }
  0x1e   :  { %p492_p0 = por %p491_p13, %p490_p12 }
  0x20   :  { %p493_p1 = pnand %p492_p0, %p486_p11 }
  0x22   :  { %496 = shalt.err (!%p493_p1)
}
  0x23   :  { %23 = dma.hbm_to_vmem [thread:$0]  %s670_s0, 128, %s21_s12, [#allocation4]  }
  0x24   :  { %s497_s26 = scalar_lea.hbm %s672_s2, 2048 }
  0x25   :  { %p498_p2 = scmp.ne.s32.totalorder %s672_s2, %s497_s26  ;;  %p501_p3 = scmp.lt.u32.totalorder %s497_s26, %s672_s2 }
  0x27   :  { %p503_p4 = pnand %p501_p3, %p498_p2 }
  0x29   :  { %506 = shalt.err (!%p503_p4)
}
  0x2a   :  { %s507_s9 = scalar_lea.vmem %s42_s14, 2048  ;;  %p512_p6 = scmp.lt.s32.totalorder %s42_s14, %s42_s14 }
  0x2b   :  { %p508_p5 = scmp.ne.s32.totalorder %s42_s14, %s507_s9  ;;  %p513_p7 = scmp.lt.s32.totalorder %s507_s9, %s507_s9 }
  0x2d   :  { %p514_p8 = por %p513_p7, %p512_p6 }
  0x2f   :  { %p515_p9 = pnand %p514_p8, %p508_p5 }
  0x31   :  { %518 = shalt.err (!%p515_p9)
}
  0x32   :  { %47 = dma.hbm_to_vmem [thread:$0]  %s672_s2, 2048, %s42_s14, [#allocation7], %s548_s7, %s548_s7, %s549_s8  }
  0x33   :  { %541 = dma.done.wait [#allocation4], 128  }
  0x34   :  { %542 = vsyncadd [#allocation4], 4294967168 }
  0x35   :  { %543 = dma.done.wait [#allocation7], 4096  }
  0x36   :  { %544 = vsyncadd [#allocation7], 4294963200  ;;  %v552_v0 = vmov 0.0|0.0   ;;  %vm553_vm0 = vmmov 0   ;;  %v554_v1 = vmov 0.0   ;;  %v93_v2 = vld [vmem:[#allocation8] sm:$0xff] }
  0x37   :  { %396 = vmatprep.subr.bf16.mxu0 %v552_v0  ;;  %420 = vmatprep.subr.bf16.mxu1 %v552_v0  ;;  %v94_v3 = vld [vmem:[#allocation8 + $0x8] sm:$0xff]  ;;  %v77_v4 = vld [vmem:[#allocation6] sm:$0xff]  ;;  %v95_v8 = vld [vmem:[#allocation8 + $0x10] sm:$0xff]  ;;  %s555_s14 = smov [#allocation9]  }
  0x38   :  { %358 = vmatprep.mubr.msk.f32.mxu0 %vm553_vm0, %v554_v1  ;;  %393 = vmatprep.mubr.msk.f32.mxu1 %vm553_vm0, %v554_v1  ;;  %v397_v5 = vpack.c.bf16 %v94_v3, %v93_v2  ;;  %v78_v6 = vld [vmem:[#allocation6 + $0x8] sm:$0xff]  ;;  %v96_v9 = vld [vmem:[#allocation8 + $0x18] sm:$0xff]  ;;  %v79_v10 = vld [vmem:[#allocation6 + $0x10] sm:$0xff]  ;;  %s279_s15 = sshll.u32 %s555_s14, 4  ;;  %s280_s15 = int_to_ptr.vmem [resolvable:$true] %s279_s15 }
  0x39   :  { %v421_v7 = vpack.c.bf16 %v78_v6, %v77_v4  ;;  %v80_v11 = vld [vmem:[#allocation6 + $0x18] sm:$0xff]  ;;  %v400_v12 = vpack.c.bf16 %v96_v9, %v95_v8  ;;  %v97_v14 = vld [vmem:[#allocation8 + $0x20] sm:$0xff]  ;;  %v98_v15 = vld [vmem:[#allocation8 + $0x28] sm:$0xff]  ;;  %p524_p11 = scmp.lt.s32.totalorder %s280_s15, %s280_s15 }
  0x3a   :  { %398 = vmatpush3.bf16.xpose.msra.mxu0 %v397_v5  ;;  %v424_v13 = vpack.c.bf16 %v80_v11, %v79_v10  ;;  %v81_v16 = vld [vmem:[#allocation6 + $0x20] sm:$0xff]  ;;  %v82_v17 = vld [vmem:[#allocation6 + $0x28] sm:$0xff]  ;;  %v403_v18 = vpack.c.bf16 %v98_v15, %v97_v14  ;;  %v99_v20 = vld [vmem:[#allocation8 + $0x30] sm:$0xff] }
  0x3b   :  { %422 = vmatpush3.bf16.xpose.msra.mxu1 %v421_v7  ;;  %399 = vmatprep.subr.bf16.mxu0 %v552_v0  ;;  %v427_v19 = vpack.c.bf16 %v82_v17, %v81_v16  ;;  %v100_v21 = vld [vmem:[#allocation8 + $0x38] sm:$0xff]  ;;  %v83_v22 = vld [vmem:[#allocation6 + $0x30] sm:$0xff]  ;;  %v101_v26 = vld [vmem:[#allocation8 + $0x40] sm:$0xff] }
  0x3c   :  { %423 = vmatprep.subr.bf16.mxu1 %v552_v0  ;;  %v84_v23 = vld [vmem:[#allocation6 + $0x38] sm:$0xff]  ;;  %v406_v24 = vpack.c.bf16 %v100_v21, %v99_v20  ;;  %v102_v27 = vld [vmem:[#allocation8 + $0x48] sm:$0xff]  ;;  %v85_v28 = vld [vmem:[#allocation6 + $0x40] sm:$0xff] }
  0x3d   :  { %v430_v25 = vpack.c.bf16 %v84_v23, %v83_v22  ;;  %v86_v29 = vld [vmem:[#allocation6 + $0x48] sm:$0xff]  ;;  %v409_v30 = vpack.c.bf16 %v102_v27, %v101_v26  ;;  %v103_v32 = vld [vmem:[#allocation8 + $0x50] sm:$0xff]  ;;  %v104_v33 = vld [vmem:[#allocation8 + $0x58] sm:$0xff] }
  0x3e   :  { %v433_v31 = vpack.c.bf16 %v86_v29, %v85_v28  ;;  %v87_v34 = vld [vmem:[#allocation6 + $0x50] sm:$0xff]  ;;  %v88_v35 = vld [vmem:[#allocation6 + $0x58] sm:$0xff]  ;;  %v412_v36 = vpack.c.bf16 %v104_v33, %v103_v32  ;;  %v105_v38 = vld [vmem:[#allocation8 + $0x60] sm:$0xff] }
  0x3f   :  { %v436_v37 = vpack.c.bf16 %v88_v35, %v87_v34  ;;  %v106_v39 = vld [vmem:[#allocation8 + $0x68] sm:$0xff]  ;;  %v89_v40 = vld [vmem:[#allocation6 + $0x60] sm:$0xff]  ;;  %v107_v44 = vld [vmem:[#allocation8 + $0x70] sm:$0xff] }
  0x40   :  { %v90_v41 = vld [vmem:[#allocation6 + $0x68] sm:$0xff]  ;;  %v415_v42 = vpack.c.bf16 %v106_v39, %v105_v38  ;;  %v108_v45 = vld [vmem:[#allocation8 + $0x78] sm:$0xff]  ;;  %v91_v46 = vld [vmem:[#allocation6 + $0x70] sm:$0xff] }
  0x41   :  { %v439_v43 = vpack.c.bf16 %v90_v41, %v89_v40  ;;  %v92_v47 = vld [vmem:[#allocation6 + $0x78] sm:$0xff]  ;;  %v418_v48 = vpack.c.bf16 %v108_v45, %v107_v44 }
  0x42   :  { %401 = vmatpush3.bf16.xpose.msra.mxu0 %v400_v12  ;;  %v442_v49 = vpack.c.bf16 %v92_v47, %v91_v46  ;;  %v68_v50 = vld [vmem:[#allocation3] sm:$0xff] }
  0x43   :  { %425 = vmatpush3.bf16.xpose.msra.mxu1 %v424_v13  ;;  %402 = vmatprep.subr.bf16.mxu0 %v552_v0  ;;  %v289_v51 = vld [vmem:[%s673_s3] ss:$0 sm:$0xff]  ;;  %s519_s3 = scalar_lea.vmem %s280_s15, 128 }
  0x44   :  { %426 = vmatprep.subr.bf16.mxu1 %v552_v0  ;;  %v76_v52 = vmul.f32 %v289_v51, %v68_v50  ;;  %v290_v53 = vld [vmem:[%s674_s4] ss:$0 sm:$0xff]  ;;  %p520_p10 = scmp.ne.s32.totalorder %s280_s15, %s519_s3  ;;  %p525_p12 = scmp.lt.s32.totalorder %s519_s3, %s519_s3 }
  0x45   :  { %v291_v58 = vld [vmem:[%s675_s5] ss:$0 sm:$0xff] }
  0x46   :  { %p526_p13 = por %p525_p12, %p524_p11 }
  0x48   :  { %p527_p0 = pnand %p526_p13, %p520_p10 }
  0x4a   :  { %404 = vmatpush3.bf16.xpose.msra.mxu0 %v403_v18 }
  0x4b   :  { %428 = vmatpush3.bf16.xpose.msra.mxu1 %v427_v19  ;;  %405 = vmatprep.subr.bf16.mxu0 %v552_v0 }
  0x4c   :  { %429 = vmatprep.subr.bf16.mxu1 %v552_v0 }
  0x52   :  { %407 = vmatpush3.bf16.xpose.msra.mxu0 %v406_v24 }
  0x53   :  { %431 = vmatpush3.bf16.xpose.msra.mxu1 %v430_v25  ;;  %408 = vmatprep.subr.bf16.mxu0 %v552_v0 }
  0x54   :  { %432 = vmatprep.subr.bf16.mxu1 %v552_v0 }
  0x5a   :  { %410 = vmatpush3.bf16.xpose.msra.mxu0 %v409_v30 }
  0x5b   :  { %434 = vmatpush3.bf16.xpose.msra.mxu1 %v433_v31  ;;  %411 = vmatprep.subr.bf16.mxu0 %v552_v0 }
  0x5c   :  { %435 = vmatprep.subr.bf16.mxu1 %v552_v0 }
  0x62   :  { %413 = vmatpush3.bf16.xpose.msra.mxu0 %v412_v36 }
  0x63   :  { %437 = vmatpush3.bf16.xpose.msra.mxu1 %v436_v37  ;;  %414 = vmatprep.subr.bf16.mxu0 %v552_v0 }
  0x64   :  { %438 = vmatprep.subr.bf16.mxu1 %v552_v0 }
  0x6a   :  { %416 = vmatpush3.bf16.xpose.msra.mxu0 %v415_v42 }
  0x6b   :  { %440 = vmatpush3.bf16.xpose.msra.mxu1 %v439_v43  ;;  %417 = vmatprep.subr.bf16.mxu0 %v552_v0 }
  0x6c   :  { %441 = vmatprep.subr.bf16.mxu1 %v552_v0 }
  0x72   :  { %419 = vmatpush3.bf16.xpose.msra.mxu0 %v418_v48 }
  0x73   :  { %443 = vmatpush3.bf16.xpose.msra.mxu1 %v442_v49 }
  0x79   :  { %359 = vmatmul.mubr.f32.vlgmr.msra.gmra.mrb[0].mxu0 %v76_v52 }
  0x7a   :  { %394 = vmatmul.mubr.f32.vlgmr.msra.gmra.mrb[0].mxu1 %v68_v50 }
 0x14c   :  { %v175_v54 = vpop.f32.mrb[0].mxu0 }
 0x14d   :  { %v187_v55 = vmul.f32 %v290_v53, %v175_v54  ;;  %v360_v56 = vpop.f32.mrb[1].mxu0  ;;  %v254_v57 = vpop.f32.mrb[0].mxu1 }
 0x14e   :  { %v395_v59 = vpop.f32.mrb[1].mxu1 }
 0x14f   :  { %v255_v60 = vadd.f32 %v254_v57, %v187_v55 }
 0x151   :  { %v271_v61 = vadd.f32 %v291_v58, %v255_v60 }
 0x153   :  { %272 = vst [vmem:[#allocation9] sm:$0xff] %v271_v61 }
 0x154   :  { %530 = shalt.err (!%p527_p0)
}
 0x155   :  { %s531_s17 = scalar_lea.hbm %s676_s6, 128 }
 0x156   :  { %p532_p1 = scmp.ne.s32.totalorder %s676_s6, %s531_s17  ;;  %p535_p2 = scmp.lt.u32.totalorder %s531_s17, %s676_s6 }
 0x158   :  { %p537_p3 = pnand %p535_p2, %p532_p1 }
 0x15a   :  { %540 = shalt.err (!%p537_p3)
}
 0x15b   :  { %282 = dma.vmem_to_hbm [thread:$0]  %s280_s15, 128, %s676_s6, [#allocation5]  }
 0x15c   :  { %545 = dma.done.wait [#allocation5], 128  }
 0x15d   :  { %546 = vsyncadd [#allocation5], 4294967168 }
 0x15e   :  { %286 = vsyncpa [#allocation4], 1 }
 0x15f   :  { %287 = vsyncpa [#allocation7], 1 }
 0x160   :  { %288 = vsyncpa [#allocation5], 1 }

</bundles_post_ra>
